<compile_context>
chip_gen: v7x
topology: tpu7x:2x2x1
jax: 0.10.0
libtpu: 0.0.40
codegen_flags: <defaults>
</compile_context>

<pallas_src>
import functools

import jax
import jax.numpy as jnp
from jax.experimental import pallas as pl
from jax.experimental.pallas import tpu as pltpu


# ---------------------------------------------------------------------------
# In-kernel helper (traced inside the Pallas kernel body).
# ---------------------------------------------------------------------------
def _edge_softmax(e_raw, mask_bias):
    """leaky_relu(0.2) then softmax over the last (src) axis via an additive mask.

    mask_bias is 0 on edges and -1e9 elsewhere, so masked entries underflow
    exp() to exactly 0 (assumes every dst node has >= 1 in-edge, which DGL's
    GATConv requires anyway).
    """
    scores = jnp.where(e_raw > 0.0, e_raw, 0.2 * e_raw) + mask_bias
    m = jnp.max(scores, axis=-1, keepdims=True)
    p = jnp.exp(scores - m)
    denom = jnp.sum(p, axis=-1, keepdims=True)          # >= 1 (max entry contributes 1)
    return p * pl.reciprocal(denom, approx=True)


# ---------------------------------------------------------------------------
# Fused 2-layer GAT forward kernel (one grid step == one graph, all in VMEM).
# ---------------------------------------------------------------------------
def _gat2_kernel(x_ref, mb_ref, w0_ref, w1_ref, vec_ref, o_ref, h0_ref,
                 *, num_heads, hidden, out_ch):
    H = num_heads
    x = x_ref[0]                                       # (N, Fin)
    mb = mb_ref[0]                                     # (N, N) additive edge mask
    N = x.shape[0]

    # ---- layer 0: one fused matmul -> Z (all heads) + el/er scores (all heads) ----
    z0 = H * hidden
    zs0 = jnp.dot(x, w0_ref[...], preferred_element_type=jnp.float32)   # (N, H*hidden+2H)
    el0_t = jnp.transpose(zs0[:, z0:z0 + H])                            # (H, N) one XLU xpose
    bn_scale = vec_ref[H:H + 1, :hidden]                                # (1, hidden)
    bn_shift = vec_ref[H + 1:H + 2, :hidden]

    for h in range(H):                                  # static unroll (H small)
        er = zs0[:, z0 + H + h:z0 + H + h + 1]          # (N, 1) dst scores
        alpha = _edge_softmax(er + el0_t[h:h + 1, :], mb)               # (N, N)
        z_h = zs0[:, h * hidden:(h + 1) * hidden]                       # (N, hidden)
        out_h = jnp.dot(alpha, z_h, preferred_element_type=jnp.float32)
        out_h = out_h + vec_ref[h:h + 1, :hidden]       # per-head bias
        out_h = jnp.maximum(out_h, 0.0)                 # layer-0 activation (relu)
        # dropout = identity (eval); BatchNorm1d(hidden) eval = scale/shift
        h0_ref[h * N:(h + 1) * N, :] = out_h * bn_scale + bn_shift      # row-stacked heads

    # ---- layer 1: one fused matmul over the row-stacked (H*N, hidden) input ----
    z1 = H * out_ch
    zs1 = jnp.dot(h0_ref[...], w1_ref[...], preferred_element_type=jnp.float32)  # (H*N, H*out+2H)
    el1_t = jnp.transpose(zs1[:, z1:z1 + H])                                      # (H, H*N)
    b1 = vec_ref[H + 2:H + 3, :z1]                                                 # (1, H*out)

    for p in range(H):                                  # prefix slice == layer-0 head
        r0 = p * N
        for h in range(H):
            er = zs1[r0:r0 + N, z1 + H + h:z1 + H + h + 1]          # (N, 1)
            el_row = el1_t[h:h + 1, r0:r0 + N]                      # (1, N)
            alpha = _edge_softmax(er + el_row, mb)
            z_ph = zs1[r0:r0 + N, h * out_ch:(h + 1) * out_ch]      # (N, out)
            res = jnp.dot(alpha, z_ph, preferred_element_type=jnp.float32)
            res = res + b1[:, h * out_ch:(h + 1) * out_ch]
            c0 = (p * H + h) * out_ch
            o_ref[0, :, c0:c0 + out_ch] = res           # direct lane-slice store, no concat


# ---------------------------------------------------------------------------
# Host-side one-time parameter packing.
# ---------------------------------------------------------------------------
def _pack_layer(w, a_l, a_r):
    """(H,Fin,Fout),(H,Fout),(H,Fout) -> (Fin, H*Fout + 2H).

    Columns [0:H*Fout]   : head-major packed W (gives Z for all heads)
    Columns [H*Fout:+H]  : W_h @ a_l_h  (gives el per head)
    Columns [H*Fout+H:+H]: W_h @ a_r_h  (gives er per head)
    """
    h, fin, fout = w.shape
    wz = jnp.transpose(w, (1, 0, 2)).reshape(fin, h * fout)
    wel = jnp.einsum("hfo,ho->fh", w, a_l)
    wer = jnp.einsum("hfo,ho->fh", w, a_r)
    return jnp.concatenate([wz, wel, wer], axis=1)


def pack_gat_params(layer0, layer1, bn, eps=1e-5):
    """Pack all parameters into 3 kernel inputs (call ONCE, outside the hot path)."""
    w0, al0, ar0, b0 = layer0
    w1, al1, ar1, b1 = layer1
    gamma, beta, running_mean, running_var = bn
    num_heads, _, hidden = w0.shape
    _, _, out_ch = w1.shape

    w0a = _pack_layer(w0, al0, ar0)                     # (Fin,    H*hidden + 2H)
    w1a = _pack_layer(w1, al1, ar1)                     # (hidden, H*out    + 2H)

    # BN eval: y = x*scale + shift
    scale = gamma / jnp.sqrt(running_var + eps)
    shift = beta - running_mean * scale

    maxw = max(hidden, num_heads * out_ch)
    vecs = jnp.zeros((num_heads + 3, maxw), jnp.float32)
    vecs = vecs.at[:num_heads, :hidden].set(b0)                          # rows 0..H-1: b0_h
    vecs = vecs.at[num_heads, :hidden].set(scale)                        # row H      : BN scale
    vecs = vecs.at[num_heads + 1, :hidden].set(shift)                    # row H+1    : BN shift
    vecs = vecs.at[num_heads + 2, :num_heads * out_ch].set(b1.reshape(-1))  # row H+2 : b1
    return w0a, w1a, vecs, (num_heads, hidden, out_ch)


# ---------------------------------------------------------------------------
# Jitted forward wrapper (batched over graphs via a parallel grid axis).
# ---------------------------------------------------------------------------
@functools.partial(jax.jit, static_argnames=("num_heads", "hidden", "out_ch"))
def gat_forward(adj, x, w0a, w1a, vecs, *, num_heads, hidden, out_ch):
    """adj: (G, N, N), x: (G, N, Fin) -> (G, N, H, H, out_ch) (eval-mode forward)."""
    G, N, fin = x.shape
    H = num_heads
    out_w = H * H * out_ch

    # Precomputed additive mask bias: 0 on edges, -1e9 elsewhere (no selects in-kernel).
    mask_bias = jnp.where(adj > 0.0, 0.0, -1e9).astype(jnp.float32)

    kernel = functools.partial(_gat2_kernel, num_heads=H, hidden=hidden, out_ch=out_ch)
    out2d = pl.pallas_call(
        kernel,
        grid=(G,),
        in_specs=[
            pl.BlockSpec((1, N, fin), lambda g: (g, 0, 0)),
            pl.BlockSpec((1, N, N), lambda g: (g, 0, 0)),
            pl.BlockSpec(w0a.shape, lambda g: (0, 0)),
            pl.BlockSpec(w1a.shape, lambda g: (0, 0)),
            pl.BlockSpec(vecs.shape, lambda g: (0, 0)),
        ],
        out_specs=pl.BlockSpec((1, N, out_w), lambda g: (g, 0, 0)),
        out_shape=jax.ShapeDtypeStruct((G, N, out_w), jnp.float32),
        scratch_shapes=[pltpu.VMEM((H * N, hidden), jnp.float32)],   # row-stacked layer-0 out
        compiler_params=pltpu.CompilerParams(dimension_semantics=("parallel",)),
    )(x, mask_bias, w0a, w1a, vecs)
    # Row-major reshape is a free view (columns ordered [p, h, out_ch]).
    return out2d.reshape(G, N, H, H, out_ch)


# ---------------------------------------------------------------------------
# Pure-JAX reference (mirrors DGL GATConv math) for a correctness check.
# ---------------------------------------------------------------------------
def _gat_conv_ref(adj, x, params, apply_relu):
    w, a_l, a_r, bias = params
    squeeze = x.ndim == 2
    if squeeze:
        x = x[:, None, :]
    z = jnp.einsum("npf,hfo->npho", x, w)                         # (N,P,H,F)
    el = jnp.einsum("npho,ho->nph", z, a_l)                       # src scores
    er = jnp.einsum("npho,ho->nph", z, a_r)                       # dst scores
    e = er[:, None, :, :] + el[None, :, :, :]                     # (dst,src,P,H)
    e = jnp.where(e >= 0.0, e, 0.2 * e)
    mask = (adj > 0.0)[:, :, None, None]
    scores = jnp.where(mask, e, -1e30)
    m = jnp.max(scores, axis=1, keepdims=True)
    p = jnp.where(mask, jnp.exp(scores - m), 0.0)
    denom = jnp.sum(p, axis=1, keepdims=True)
    alpha = p / jnp.maximum(denom, 1e-30)
    out = jnp.einsum("dsph,spho->dpho", alpha, z) + bias          # (N,P,H,F)
    if apply_relu:
        out = jnp.maximum(out, 0.0)
    return out[:, 0] if squeeze else out


def gat_forward_ref(adj, x, layer0, layer1, bn, eps=1e-5):
    gamma, beta, running_mean, running_var = bn
    h = _gat_conv_ref(adj, x, layer0, apply_relu=True)            # (N,H,hidden)
    h = (h - running_mean) / jnp.sqrt(running_var + eps) * gamma + beta
    return _gat_conv_ref(adj, h, layer1, apply_relu=False)        # (N,P,H,out)


# ---------------------------------------------------------------------------
# Deterministic parameter construction + example run.
# ---------------------------------------------------------------------------
def _make_gatconv_params(key, fin, fout, heads):
    k1, k2, k3, k4 = jax.random.split(key, 4)
    w = 0.2 * jax.random.normal(k1, (heads, fin, fout), jnp.float32)
    a_l = 0.2 * jax.random.normal(k2, (heads, fout), jnp.float32)
    a_r = 0.2 * jax.random.normal(k3, (heads, fout), jnp.float32)
    bias = 0.1 * jax.random.normal(k4, (heads, fout), jnp.float32)
    return (w, a_l, a_r, bias)


if __name__ == "__main__":
    # GAT(in_channels=4, hidden_channels=32, out_channels=16,
    #     n_layers=2, num_heads=2, use_bn=True, dropout=0.5, activation='relu')
    in_channels, hidden_channels, out_channels = 4, 32, 16
    num_heads = 2
    N = 8      # nodes per graph
    G = 4      # graphs per batched pallas_call (parallel grid axis)

    key = jax.random.PRNGKey(0)
    k_x, k_l0, k_l1, k_g, k_b, k_m, k_v = jax.random.split(key, 7)

    # node features, per graph
    x = jax.random.normal(k_x, (G, N, in_channels), jnp.float32)

    # per-graph ring graph with self-loops (every node has >=1 in-edge), plus one
    # distinct extra symmetric edge per graph so the batched graphs differ.
    eye = jnp.eye(N, dtype=jnp.float32)
    src = jnp.arange(N)
    dst = (src + 1) % N
    ring = eye.at[dst, src].set(1.0)
    ring = ring.at[src, dst].set(1.0)
    adj = jnp.tile(ring[None], (G, 1, 1))
    extra = (jnp.arange(G) + 3) % N
    adj = adj.at[jnp.arange(G), extra, 0].set(1.0)
    adj = adj.at[jnp.arange(G), 0, extra].set(1.0)

    layer0 = _make_gatconv_params(k_l0, in_channels, hidden_channels, num_heads)
    layer1 = _make_gatconv_params(k_l1, hidden_channels, out_channels, num_heads)

    # BatchNorm1d(hidden_channels), eval mode with non-trivial running stats/affine.
    gamma = 1.0 + 0.1 * jax.random.normal(k_g, (hidden_channels,), jnp.float32)
    beta = 0.1 * jax.random.normal(k_b, (hidden_channels,), jnp.float32)
    running_mean = 0.2 * jax.random.normal(k_m, (hidden_channels,), jnp.float32)
    running_var = 1.0 + 0.1 * jnp.abs(jax.random.normal(k_v, (hidden_channels,), jnp.float32))
    bn = (gamma, beta, running_mean, running_var)

    # Parameter packing happens ONCE, outside the per-call path.
    w0a, w1a, vecs, (H, hid, oc) = pack_gat_params(layer0, layer1, bn)

    out = gat_forward(adj, x, w0a, w1a, vecs, num_heads=H, hidden=hid, out_ch=oc)
    out = jax.block_until_ready(out)

    # expected: (G, N, prev_heads, num_heads, out_channels) = (4, 8, 2, 2, 16)
    assert out.shape == (G, N, num_heads, num_heads, out_channels), out.shape
    assert bool(jnp.all(jnp.isfinite(out)))

    # correctness vs. pure-JAX reference (loose tol for MXU / approx-reciprocal paths)
    ref = jax.vmap(lambda a, xx: gat_forward_ref(a, xx, layer0, layer1, bn))(adj, x)
    err = float(jnp.max(jnp.abs(out - ref)))
    assert err < 1e-2, f"max abs error vs reference: {err}"

    print("KERNEL_OK")
</pallas_src>

<mosaic_0001>
module attributes {stable_mosaic.version = 11 : i64} {
  func.func @_gat2_kernel(%arg0: i32, %arg1: memref<1x8x4xf32, #tpu.memory_space<vmem>>, %arg2: memref<1x8x8xf32, #tpu.memory_space<vmem>>, %arg3: memref<4x68xf32, #tpu.memory_space<vmem>>, %arg4: memref<32x36xf32, #tpu.memory_space<vmem>>, %arg5: memref<5x32xf32, #tpu.memory_space<vmem>>, %arg6: memref<1x8x64xf32, #tpu.memory_space<vmem>>, %arg7: memref<16x32xf32, #tpu.memory_space<vmem>>) attributes {dimension_semantics = [#tpu.dimension_semantics<parallel>], iteration_bounds = array<i64: 4>, scalar_prefetch = 0 : i64, scratch_operands = 1 : i64, tpu.core_type = #tpu.core_type<tc>, window_params = [{transform_indices = @transform_0, window_bounds = array<i64: 1, 8, 4>}, {transform_indices = @transform_1, window_bounds = array<i64: 1, 8, 8>}, {pipeline_mode = #tpu.pipeline_mode<synchronous>, transform_indices = @transform_2, window_bounds = array<i64: 4, 68>}, {pipeline_mode = #tpu.pipeline_mode<synchronous>, transform_indices = @transform_3, window_bounds = array<i64: 32, 36>}, {pipeline_mode = #tpu.pipeline_mode<synchronous>, transform_indices = @transform_4, window_bounds = array<i64: 5, 32>}, {transform_indices = @transform_5, window_bounds = array<i64: 1, 8, 64>}]} {
    %c0 = arith.constant 0 : index
    %c0_0 = arith.constant 0 : index
    %c0_1 = arith.constant 0 : index
    %0 = vector.load %arg1[%c0, %c0_0, %c0_1] : memref<1x8x4xf32, #tpu.memory_space<vmem>>, vector<1x8x4xf32>
    %1 = vector.shape_cast %0 : vector<1x8x4xf32> to vector<8x4xf32>
    %c0_2 = arith.constant 0 : index
    %c0_3 = arith.constant 0 : index
    %c0_4 = arith.constant 0 : index
    %2 = vector.load %arg2[%c0_2, %c0_3, %c0_4] : memref<1x8x8xf32, #tpu.memory_space<vmem>>, vector<1x8x8xf32>
    %3 = vector.shape_cast %2 : vector<1x8x8xf32> to vector<8x8xf32>
    %c0_5 = arith.constant 0 : index
    %c0_6 = arith.constant 0 : index
    %4 = vector.load %arg3[%c0_5, %c0_6] : memref<4x68xf32, #tpu.memory_space<vmem>>, vector<4x68xf32>
    %cst = arith.constant dense<0.000000e+00> : vector<8x68xf32>
    %5 = tpu.matmul %1, %4, %cst {dimension_numbers = #tpu.dot_dimension_numbers<[1], [0], [0], [1], [0, 0, 1, 1], [], []>} : vector<8x4xf32>, vector<4x68xf32>, vector<8x68xf32> -> vector<8x68xf32>
    %6 = vector.extract_strided_slice %5 {offsets = [0, 64], sizes = [8, 2], strides = [1, 1]} : vector<8x68xf32> to vector<8x2xf32>
    %7 = tpu.transpose %6, [1, 0] : vector<8x2xf32> -> vector<2x8xf32>
    %c2 = arith.constant 2 : index
    %c0_7 = arith.constant 0 : index
    %8 = vector.load %arg5[%c2, %c0_7] : memref<5x32xf32, #tpu.memory_space<vmem>>, vector<1x32xf32>
    %c3 = arith.constant 3 : index
    %c0_8 = arith.constant 0 : index
    %9 = vector.load %arg5[%c3, %c0_8] : memref<5x32xf32, #tpu.memory_space<vmem>>, vector<1x32xf32>
    %10 = vector.extract_strided_slice %5 {offsets = [0, 66], sizes = [8, 1], strides = [1, 1]} : vector<8x68xf32> to vector<8x1xf32>
    %11 = vector.extract_strided_slice %7 {offsets = [0, 0], sizes = [1, 8], strides = [1, 1]} : vector<2x8xf32> to vector<1x8xf32>
    %12 = vector.broadcast %10 : vector<8x1xf32> to vector<8x8xf32>
    %13 = vector.broadcast %11 : vector<1x8xf32> to vector<8x8xf32>
    %14 = arith.addf %12, %13 : vector<8x8xf32>
    %cst_9 = arith.constant 0.000000e+00 : f32
    %15 = vector.broadcast %cst_9 : f32 to vector<8x8xf32>
    %16 = arith.cmpf ogt, %14, %15 : vector<8x8xf32>
    %cst_10 = arith.constant 2.000000e-01 : f32
    %17 = vector.broadcast %cst_10 : f32 to vector<8x8xf32>
    %18 = arith.mulf %17, %14 : vector<8x8xf32>
    %19 = arith.select %16, %14, %18 : vector<8x8xi1>, vector<8x8xf32>
    %20 = arith.addf %19, %3 : vector<8x8xf32>
    %cst_11 = arith.constant dense<0xFF800000> : vector<8xf32>
    %21 = vector.multi_reduction <maximumf>, %20, %cst_11 [1] : vector<8x8xf32> to vector<8xf32>
    %22 = vector.shape_cast %21 : vector<8xf32> to vector<8x1xf32>
    %23 = vector.broadcast %22 : vector<8x1xf32> to vector<8x8xf32>
    %24 = arith.subf %20, %23 : vector<8x8xf32>
    %25 = math.exp %24 : vector<8x8xf32>
    %cst_12 = arith.constant dense<0.000000e+00> : vector<8xf32>
    %26 = vector.multi_reduction <add>, %25, %cst_12 [1] : vector<8x8xf32> to vector<8xf32>
    %27 = vector.shape_cast %26 : vector<8xf32> to vector<8x1xf32>
    %28 = tpu.reciprocal %27 {approx = true} : vector<8x1xf32> -> vector<8x1xf32>
    %29 = vector.broadcast %28 : vector<8x1xf32> to vector<8x8xf32>
    %30 = arith.mulf %25, %29 : vector<8x8xf32>
    %31 = vector.extract_strided_slice %5 {offsets = [0, 0], sizes = [8, 32], strides = [1, 1]} : vector<8x68xf32> to vector<8x32xf32>
    %cst_13 = arith.constant dense<0.000000e+00> : vector<8x32xf32>
    %32 = tpu.matmul %30, %31, %cst_13 {dimension_numbers = #tpu.dot_dimension_numbers<[1], [0], [0], [1], [0, 0, 1, 1], [], []>} : vector<8x8xf32>, vector<8x32xf32>, vector<8x32xf32> -> vector<8x32xf32>
    %c0_14 = arith.constant 0 : index
    %c0_15 = arith.constant 0 : index
    %33 = vector.load %arg5[%c0_14, %c0_15] : memref<5x32xf32, #tpu.memory_space<vmem>>, vector<1x32xf32>
    %34 = vector.broadcast %33 : vector<1x32xf32> to vector<8x32xf32>
    %35 = arith.addf %32, %34 : vector<8x32xf32>
    %cst_16 = arith.constant 0.000000e+00 : f32
    %36 = vector.broadcast %cst_16 : f32 to vector<8x32xf32>
    %37 = arith.maximumf %35, %36 : vector<8x32xf32>
    %38 = vector.broadcast %8 : vector<1x32xf32> to vector<8x32xf32>
    %39 = arith.mulf %37, %38 : vector<8x32xf32>
    %40 = vector.broadcast %9 : vector<1x32xf32> to vector<8x32xf32>
    %41 = arith.addf %39, %40 : vector<8x32xf32>
    %c0_17 = arith.constant 0 : index
    %c0_18 = arith.constant 0 : index
    %42 = vector.load %arg7[%c0_17, %c0_18] : memref<16x32xf32, #tpu.memory_space<vmem>>, vector<8x32xf32>
    tpu.vector_store %arg7[%c0_17, %c0_18], %41 {strides = array<i32>} : memref<16x32xf32, #tpu.memory_space<vmem>>, vector<8x32xf32>,
    %43 = vector.extract_strided_slice %5 {offsets = [0, 67], sizes = [8, 1], strides = [1, 1]} : vector<8x68xf32> to vector<8x1xf32>
    %44 = vector.extract_strided_slice %7 {offsets = [1, 0], sizes = [1, 8], strides = [1, 1]} : vector<2x8xf32> to vector<1x8xf32>
    %45 = vector.broadcast %43 : vector<8x1xf32> to vector<8x8xf32>
    %46 = vector.broadcast %44 : vector<1x8xf32> to vector<8x8xf32>
    %47 = arith.addf %45, %46 : vector<8x8xf32>
    %cst_19 = arith.constant 0.000000e+00 : f32
    %48 = vector.broadcast %cst_19 : f32 to vector<8x8xf32>
    %49 = arith.cmpf ogt, %47, %48 : vector<8x8xf32>
    %cst_20 = arith.constant 2.000000e-01 : f32
    %50 = vector.broadcast %cst_20 : f32 to vector<8x8xf32>
    %51 = arith.mulf %50, %47 : vector<8x8xf32>
    %52 = arith.select %49, %47, %51 : vector<8x8xi1>, vector<8x8xf32>
    %53 = arith.addf %52, %3 : vector<8x8xf32>
    %cst_21 = arith.constant dense<0xFF800000> : vector<8xf32>
    %54 = vector.multi_reduction <maximumf>, %53, %cst_21 [1] : vector<8x8xf32> to vector<8xf32>
    %55 = vector.shape_cast %54 : vector<8xf32> to vector<8x1xf32>
    %56 = vector.broadcast %55 : vector<8x1xf32> to vector<8x8xf32>
    %57 = arith.subf %53, %56 : vector<8x8xf32>
    %58 = math.exp %57 : vector<8x8xf32>
    %cst_22 = arith.constant dense<0.000000e+00> : vector<8xf32>
    %59 = vector.multi_reduction <add>, %58, %cst_22 [1] : vector<8x8xf32> to vector<8xf32>
    %60 = vector.shape_cast %59 : vector<8xf32> to vector<8x1xf32>
    %61 = tpu.reciprocal %60 {approx = true} : vector<8x1xf32> -> vector<8x1xf32>
    %62 = vector.broadcast %61 : vector<8x1xf32> to vector<8x8xf32>
    %63 = arith.mulf %58, %62 : vector<8x8xf32>
    %64 = vector.extract_strided_slice %5 {offsets = [0, 32], sizes = [8, 32], strides = [1, 1]} : vector<8x68xf32> to vector<8x32xf32>
    %cst_23 = arith.constant dense<0.000000e+00> : vector<8x32xf32>
    %65 = tpu.matmul %63, %64, %cst_23 {dimension_numbers = #tpu.dot_dimension_numbers<[1], [0], [0], [1], [0, 0, 1, 1], [], []>} : vector<8x8xf32>, vector<8x32xf32>, vector<8x32xf32> -> vector<8x32xf32>
    %c1 = arith.constant 1 : index
    %c0_24 = arith.constant 0 : index
    %66 = vector.load %arg5[%c1, %c0_24] : memref<5x32xf32, #tpu.memory_space<vmem>>, vector<1x32xf32>
    %67 = vector.broadcast %66 : vector<1x32xf32> to vector<8x32xf32>
    %68 = arith.addf %65, %67 : vector<8x32xf32>
    %cst_25 = arith.constant 0.000000e+00 : f32
    %69 = vector.broadcast %cst_25 : f32 to vector<8x32xf32>
    %70 = arith.maximumf %68, %69 : vector<8x32xf32>
    %71 = vector.broadcast %8 : vector<1x32xf32> to vector<8x32xf32>
    %72 = arith.mulf %70, %71 : vector<8x32xf32>
    %73 = vector.broadcast %9 : vector<1x32xf32> to vector<8x32xf32>
    %74 = arith.addf %72, %73 : vector<8x32xf32>
    %c8 = arith.constant 8 : index
    %c0_26 = arith.constant 0 : index
    %75 = vector.load %arg7[%c8, %c0_26] : memref<16x32xf32, #tpu.memory_space<vmem>>, vector<8x32xf32>
    tpu.vector_store %arg7[%c8, %c0_26], %74 {strides = array<i32>} : memref<16x32xf32, #tpu.memory_space<vmem>>, vector<8x32xf32>,
    %c0_27 = arith.constant 0 : index
    %c0_28 = arith.constant 0 : index
    %76 = vector.load %arg7[%c0_27, %c0_28] : memref<16x32xf32, #tpu.memory_space<vmem>>, vector<16x32xf32>
    %c0_29 = arith.constant 0 : index
    %c0_30 = arith.constant 0 : index
    %77 = vector.load %arg4[%c0_29, %c0_30] : memref<32x36xf32, #tpu.memory_space<vmem>>, vector<32x36xf32>
    %cst_31 = arith.constant dense<0.000000e+00> : vector<16x36xf32>
    %78 = tpu.matmul %76, %77, %cst_31 {dimension_numbers = #tpu.dot_dimension_numbers<[1], [0], [0], [1], [0, 0, 1, 1], [], []>} : vector<16x32xf32>, vector<32x36xf32>, vector<16x36xf32> -> vector<16x36xf32>
    %79 = vector.extract_strided_slice %78 {offsets = [0, 32], sizes = [16, 2], strides = [1, 1]} : vector<16x36xf32> to vector<16x2xf32>
    %80 = tpu.transpose %79, [1, 0] : vector<16x2xf32> -> vector<2x16xf32>
    %c4 = arith.constant 4 : index
    %c0_32 = arith.constant 0 : index
    %81 = vector.load %arg5[%c4, %c0_32] : memref<5x32xf32, #tpu.memory_space<vmem>>, vector<1x32xf32>
    %82 = vector.extract_strided_slice %78 {offsets = [0, 34], sizes = [8, 1], strides = [1, 1]} : vector<16x36xf32> to vector<8x1xf32>
    %83 = vector.extract_strided_slice %80 {offsets = [0, 0], sizes = [1, 8], strides = [1, 1]} : vector<2x16xf32> to vector<1x8xf32>
    %84 = vector.broadcast %82 : vector<8x1xf32> to vector<8x8xf32>
    %85 = vector.broadcast %83 : vector<1x8xf32> to vector<8x8xf32>
    %86 = arith.addf %84, %85 : vector<8x8xf32>
    %cst_33 = arith.constant 0.000000e+00 : f32
    %87 = vector.broadcast %cst_33 : f32 to vector<8x8xf32>
    %88 = arith.cmpf ogt, %86, %87 : vector<8x8xf32>
    %cst_34 = arith.constant 2.000000e-01 : f32
    %89 = vector.broadcast %cst_34 : f32 to vector<8x8xf32>
    %90 = arith.mulf %89, %86 : vector<8x8xf32>
    %91 = arith.select %88, %86, %90 : vector<8x8xi1>, vector<8x8xf32>
    %92 = arith.addf %91, %3 : vector<8x8xf32>
    %cst_35 = arith.constant dense<0xFF800000> : vector<8xf32>
    %93 = vector.multi_reduction <maximumf>, %92, %cst_35 [1] : vector<8x8xf32> to vector<8xf32>
    %94 = vector.shape_cast %93 : vector<8xf32> to vector<8x1xf32>
    %95 = vector.broadcast %94 : vector<8x1xf32> to vector<8x8xf32>
    %96 = arith.subf %92, %95 : vector<8x8xf32>
    %97 = math.exp %96 : vector<8x8xf32>
    %cst_36 = arith.constant dense<0.000000e+00> : vector<8xf32>
    %98 = vector.multi_reduction <add>, %97, %cst_36 [1] : vector<8x8xf32> to vector<8xf32>
    %99 = vector.shape_cast %98 : vector<8xf32> to vector<8x1xf32>
    %100 = tpu.reciprocal %99 {approx = true} : vector<8x1xf32> -> vector<8x1xf32>
    %101 = vector.broadcast %100 : vector<8x1xf32> to vector<8x8xf32>
    %102 = arith.mulf %97, %101 : vector<8x8xf32>
    %103 = vector.extract_strided_slice %78 {offsets = [0, 0], sizes = [8, 16], strides = [1, 1]} : vector<16x36xf32> to vector<8x16xf32>
    %cst_37 = arith.constant dense<0.000000e+00> : vector<8x16xf32>
    %104 = tpu.matmul %102, %103, %cst_37 {dimension_numbers = #tpu.dot_dimension_numbers<[1], [0], [0], [1], [0, 0, 1, 1], [], []>} : vector<8x8xf32>, vector<8x16xf32>, vector<8x16xf32> -> vector<8x16xf32>
    %105 = vector.extract_strided_slice %81 {offsets = [0, 0], sizes = [1, 16], strides = [1, 1]} : vector<1x32xf32> to vector<1x16xf32>
    %106 = vector.broadcast %105 : vector<1x16xf32> to vector<8x16xf32>
    %107 = arith.addf %104, %106 : vector<8x16xf32>
    %c0_38 = arith.constant 0 : index
    %c0_39 = arith.constant 0 : index
    %c0_40 = arith.constant 0 : index
    %108 = vector.load %arg6[%c0_38, %c0_39, %c0_40] : memref<1x8x64xf32, #tpu.memory_space<vmem>>, vector<1x8x16xf32>
    %109 = vector.shape_cast %108 : vector<1x8x16xf32> to vector<8x16xf32>
    %110 = vector.shape_cast %107 : vector<8x16xf32> to vector<1x8x16xf32>
    tpu.vector_store %arg6[%c0_38, %c0_39, %c0_40], %110 {strides = array<i32>} : memref<1x8x64xf32, #tpu.memory_space<vmem>>, vector<1x8x16xf32>,
    %111 = vector.extract_strided_slice %78 {offsets = [0, 35], sizes = [8, 1], strides = [1, 1]} : vector<16x36xf32> to vector<8x1xf32>
    %112 = vector.extract_strided_slice %80 {offsets = [1, 0], sizes = [1, 8], strides = [1, 1]} : vector<2x16xf32> to vector<1x8xf32>
    %113 = vector.broadcast %111 : vector<8x1xf32> to vector<8x8xf32>
    %114 = vector.broadcast %112 : vector<1x8xf32> to vector<8x8xf32>
    %115 = arith.addf %113, %114 : vector<8x8xf32>
    %cst_41 = arith.constant 0.000000e+00 : f32
    %116 = vector.broadcast %cst_41 : f32 to vector<8x8xf32>
    %117 = arith.cmpf ogt, %115, %116 : vector<8x8xf32>
    %cst_42 = arith.constant 2.000000e-01 : f32
    %118 = vector.broadcast %cst_42 : f32 to vector<8x8xf32>
    %119 = arith.mulf %118, %115 : vector<8x8xf32>
    %120 = arith.select %117, %115, %119 : vector<8x8xi1>, vector<8x8xf32>
    %121 = arith.addf %120, %3 : vector<8x8xf32>
    %cst_43 = arith.constant dense<0xFF800000> : vector<8xf32>
    %122 = vector.multi_reduction <maximumf>, %121, %cst_43 [1] : vector<8x8xf32> to vector<8xf32>
    %123 = vector.shape_cast %122 : vector<8xf32> to vector<8x1xf32>
    %124 = vector.broadcast %123 : vector<8x1xf32> to vector<8x8xf32>
    %125 = arith.subf %121, %124 : vector<8x8xf32>
    %126 = math.exp %125 : vector<8x8xf32>
    %cst_44 = arith.constant dense<0.000000e+00> : vector<8xf32>
    %127 = vector.multi_reduction <add>, %126, %cst_44 [1] : vector<8x8xf32> to vector<8xf32>
    %128 = vector.shape_cast %127 : vector<8xf32> to vector<8x1xf32>
    %129 = tpu.reciprocal %128 {approx = true} : vector<8x1xf32> -> vector<8x1xf32>
    %130 = vector.broadcast %129 : vector<8x1xf32> to vector<8x8xf32>
    %131 = arith.mulf %126, %130 : vector<8x8xf32>
    %132 = vector.extract_strided_slice %78 {offsets = [0, 16], sizes = [8, 16], strides = [1, 1]} : vector<16x36xf32> to vector<8x16xf32>
    %cst_45 = arith.constant dense<0.000000e+00> : vector<8x16xf32>
    %133 = tpu.matmul %131, %132, %cst_45 {dimension_numbers = #tpu.dot_dimension_numbers<[1], [0], [0], [1], [0, 0, 1, 1], [], []>} : vector<8x8xf32>, vector<8x16xf32>, vector<8x16xf32> -> vector<8x16xf32>
    %134 = vector.extract_strided_slice %81 {offsets = [0, 16], sizes = [1, 16], strides = [1, 1]} : vector<1x32xf32> to vector<1x16xf32>
    %135 = vector.broadcast %134 : vector<1x16xf32> to vector<8x16xf32>
    %136 = arith.addf %133, %135 : vector<8x16xf32>
    %c0_46 = arith.constant 0 : index
    %c0_47 = arith.constant 0 : index
    %c16 = arith.constant 16 : index
    %137 = vector.load %arg6[%c0_46, %c0_47, %c16] : memref<1x8x64xf32, #tpu.memory_space<vmem>>, vector<1x8x16xf32>
    %138 = vector.shape_cast %137 : vector<1x8x16xf32> to vector<8x16xf32>
    %139 = vector.shape_cast %136 : vector<8x16xf32> to vector<1x8x16xf32>
    tpu.vector_store %arg6[%c0_46, %c0_47, %c16], %139 {strides = array<i32>} : memref<1x8x64xf32, #tpu.memory_space<vmem>>, vector<1x8x16xf32>,
    %140 = vector.extract_strided_slice %78 {offsets = [8, 34], sizes = [8, 1], strides = [1, 1]} : vector<16x36xf32> to vector<8x1xf32>
    %141 = vector.extract_strided_slice %80 {offsets = [0, 8], sizes = [1, 8], strides = [1, 1]} : vector<2x16xf32> to vector<1x8xf32>
    %142 = vector.broadcast %140 : vector<8x1xf32> to vector<8x8xf32>
    %143 = vector.broadcast %141 : vector<1x8xf32> to vector<8x8xf32>
    %144 = arith.addf %142, %143 : vector<8x8xf32>
    %cst_48 = arith.constant 0.000000e+00 : f32
    %145 = vector.broadcast %cst_48 : f32 to vector<8x8xf32>
    %146 = arith.cmpf ogt, %144, %145 : vector<8x8xf32>
    %cst_49 = arith.constant 2.000000e-01 : f32
    %147 = vector.broadcast %cst_49 : f32 to vector<8x8xf32>
    %148 = arith.mulf %147, %144 : vector<8x8xf32>
    %149 = arith.select %146, %144, %148 : vector<8x8xi1>, vector<8x8xf32>
    %150 = arith.addf %149, %3 : vector<8x8xf32>
    %cst_50 = arith.constant dense<0xFF800000> : vector<8xf32>
    %151 = vector.multi_reduction <maximumf>, %150, %cst_50 [1] : vector<8x8xf32> to vector<8xf32>
    %152 = vector.shape_cast %151 : vector<8xf32> to vector<8x1xf32>
    %153 = vector.broadcast %152 : vector<8x1xf32> to vector<8x8xf32>
    %154 = arith.subf %150, %153 : vector<8x8xf32>
    %155 = math.exp %154 : vector<8x8xf32>
    %cst_51 = arith.constant dense<0.000000e+00> : vector<8xf32>
    %156 = vector.multi_reduction <add>, %155, %cst_51 [1] : vector<8x8xf32> to vector<8xf32>
    %157 = vector.shape_cast %156 : vector<8xf32> to vector<8x1xf32>
    %158 = tpu.reciprocal %157 {approx = true} : vector<8x1xf32> -> vector<8x1xf32>
    %159 = vector.broadcast %158 : vector<8x1xf32> to vector<8x8xf32>
    %160 = arith.mulf %155, %159 : vector<8x8xf32>
    %161 = vector.extract_strided_slice %78 {offsets = [8, 0], sizes = [8, 16], strides = [1, 1]} : vector<16x36xf32> to vector<8x16xf32>
    %cst_52 = arith.constant dense<0.000000e+00> : vector<8x16xf32>
    %162 = tpu.matmul %160, %161, %cst_52 {dimension_numbers = #tpu.dot_dimension_numbers<[1], [0], [0], [1], [0, 0, 1, 1], [], []>} : vector<8x8xf32>, vector<8x16xf32>, vector<8x16xf32> -> vector<8x16xf32>
    %163 = vector.extract_strided_slice %81 {offsets = [0, 0], sizes = [1, 16], strides = [1, 1]} : vector<1x32xf32> to vector<1x16xf32>
    %164 = vector.broadcast %163 : vector<1x16xf32> to vector<8x16xf32>
    %165 = arith.addf %162, %164 : vector<8x16xf32>
    %c0_53 = arith.constant 0 : index
    %c0_54 = arith.constant 0 : index
    %c32 = arith.constant 32 : index
    %166 = vector.load %arg6[%c0_53, %c0_54, %c32] : memref<1x8x64xf32, #tpu.memory_space<vmem>>, vector<1x8x16xf32>
    %167 = vector.shape_cast %166 : vector<1x8x16xf32> to vector<8x16xf32>
    %168 = vector.shape_cast %165 : vector<8x16xf32> to vector<1x8x16xf32>
    tpu.vector_store %arg6[%c0_53, %c0_54, %c32], %168 {strides = array<i32>} : memref<1x8x64xf32, #tpu.memory_space<vmem>>, vector<1x8x16xf32>,
    %169 = vector.extract_strided_slice %78 {offsets = [8, 35], sizes = [8, 1], strides = [1, 1]} : vector<16x36xf32> to vector<8x1xf32>
    %170 = vector.extract_strided_slice %80 {offsets = [1, 8], sizes = [1, 8], strides = [1, 1]} : vector<2x16xf32> to vector<1x8xf32>
    %171 = vector.broadcast %169 : vector<8x1xf32> to vector<8x8xf32>
    %172 = vector.broadcast %170 : vector<1x8xf32> to vector<8x8xf32>
    %173 = arith.addf %171, %172 : vector<8x8xf32>
    %cst_55 = arith.constant 0.000000e+00 : f32
    %174 = vector.broadcast %cst_55 : f32 to vector<8x8xf32>
    %175 = arith.cmpf ogt, %173, %174 : vector<8x8xf32>
    %cst_56 = arith.constant 2.000000e-01 : f32
    %176 = vector.broadcast %cst_56 : f32 to vector<8x8xf32>
    %177 = arith.mulf %176, %173 : vector<8x8xf32>
    %178 = arith.select %175, %173, %177 : vector<8x8xi1>, vector<8x8xf32>
    %179 = arith.addf %178, %3 : vector<8x8xf32>
    %cst_57 = arith.constant dense<0xFF800000> : vector<8xf32>
    %180 = vector.multi_reduction <maximumf>, %179, %cst_57 [1] : vector<8x8xf32> to vector<8xf32>
    %181 = vector.shape_cast %180 : vector<8xf32> to vector<8x1xf32>
    %182 = vector.broadcast %181 : vector<8x1xf32> to vector<8x8xf32>
    %183 = arith.subf %179, %182 : vector<8x8xf32>
    %184 = math.exp %183 : vector<8x8xf32>
    %cst_58 = arith.constant dense<0.000000e+00> : vector<8xf32>
    %185 = vector.multi_reduction <add>, %184, %cst_58 [1] : vector<8x8xf32> to vector<8xf32>
    %186 = vector.shape_cast %185 : vector<8xf32> to vector<8x1xf32>
    %187 = tpu.reciprocal %186 {approx = true} : vector<8x1xf32> -> vector<8x1xf32>
    %188 = vector.broadcast %187 : vector<8x1xf32> to vector<8x8xf32>
    %189 = arith.mulf %184, %188 : vector<8x8xf32>
    %190 = vector.extract_strided_slice %78 {offsets = [8, 16], sizes = [8, 16], strides = [1, 1]} : vector<16x36xf32> to vector<8x16xf32>
    %cst_59 = arith.constant dense<0.000000e+00> : vector<8x16xf32>
    %191 = tpu.matmul %189, %190, %cst_59 {dimension_numbers = #tpu.dot_dimension_numbers<[1], [0], [0], [1], [0, 0, 1, 1], [], []>} : vector<8x8xf32>, vector<8x16xf32>, vector<8x16xf32> -> vector<8x16xf32>
    %192 = vector.extract_strided_slice %81 {offsets = [0, 16], sizes = [1, 16], strides = [1, 1]} : vector<1x32xf32> to vector<1x16xf32>
    %193 = vector.broadcast %192 : vector<1x16xf32> to vector<8x16xf32>
    %194 = arith.addf %191, %193 : vector<8x16xf32>
    %c0_60 = arith.constant 0 : index
    %c0_61 = arith.constant 0 : index
    %c48 = arith.constant 48 : index
    %195 = vector.load %arg6[%c0_60, %c0_61, %c48] : memref<1x8x64xf32, #tpu.memory_space<vmem>>, vector<1x8x16xf32>
    %196 = vector.shape_cast %195 : vector<1x8x16xf32> to vector<8x16xf32>
    %197 = vector.shape_cast %194 : vector<8x16xf32> to vector<1x8x16xf32>
    tpu.vector_store %arg6[%c0_60, %c0_61, %c48], %197 {strides = array<i32>} : memref<1x8x64xf32, #tpu.memory_space<vmem>>, vector<1x8x16xf32>,
    return
  }
  func.func @transform_0(%arg0: i32) -> (i32, i32, i32) {
    %c0_i32 = arith.constant 0 : i32
    %c0_i32_0 = arith.constant 0 : i32
    %c0_i32_1 = arith.constant 0 : i32
    return %arg0, %c0_i32, %c0_i32_0 : i32, i32, i32
  }
  func.func @transform_1(%arg0: i32) -> (i32, i32, i32) {
    %c0_i32 = arith.constant 0 : i32
    %c0_i32_0 = arith.constant 0 : i32
    %c0_i32_1 = arith.constant 0 : i32
    return %arg0, %c0_i32, %c0_i32_0 : i32, i32, i32
  }
  func.func @transform_2(%arg0: i32) -> (i32, i32) {
    %c0_i32 = arith.constant 0 : i32
    %c0_i32_0 = arith.constant 0 : i32
    %c0_i32_1 = arith.constant 0 : i32
    return %c0_i32, %c0_i32_0 : i32, i32
  }
  func.func @transform_3(%arg0: i32) -> (i32, i32) {
    %c0_i32 = arith.constant 0 : i32
    %c0_i32_0 = arith.constant 0 : i32
    %c0_i32_1 = arith.constant 0 : i32
    return %c0_i32, %c0_i32_0 : i32, i32
  }
  func.func @transform_4(%arg0: i32) -> (i32, i32) {
    %c0_i32 = arith.constant 0 : i32
    %c0_i32_0 = arith.constant 0 : i32
    %c0_i32_1 = arith.constant 0 : i32
    return %c0_i32, %c0_i32_0 : i32, i32
  }
  func.func @transform_5(%arg0: i32) -> (i32, i32, i32) {
    %c0_i32 = arith.constant 0 : i32
    %c0_i32_0 = arith.constant 0 : i32
    %c0_i32_1 = arith.constant 0 : i32
    return %arg0, %c0_i32, %c0_i32_0 : i32, i32, i32
  }
}

</mosaic_0001>

<bundles_post_ra>
// kernel: gat_forward.1
= control target key start
LH: loop header
LB: loop body
LE: loop exit
PB: predicated region body
PF: predicated region fallthrough
CT: control target
= control target key end

     0   :  { %s1409_s18 = smov 0   ;;  %s1544_s0 = inlined_call_operand.vmem [shape: f32[4,8,4], index: 0, kind: input, shape index: {}]   ;;  %s1545_s1 = inlined_call_operand.vmem [shape: f32[4,8,8], index: 1, kind: input, shape index: {}]   ;;  %s1546_s2 = inlined_call_operand.vmem [shape: f32[4,68], index: 2, kind: input, shape index: {}]   ;;  %s1547_s3 = inlined_call_operand.vmem [shape: f32[32,36], index: 3, kind: input, shape index: {}]   ;;  %s1548_s4 = inlined_call_operand.vmem [shape: f32[5,32], index: 4, kind: input, shape index: {}]   ;;  %s1549_s5 = inlined_call_operand.vmem [shape: f32[4,8,64], index: 5, kind: output, shape index: {}]  }
   0x1 LB: > { %s1205_s19 = sadd.s32 4294967295, %s1363_s18   ;;  %p1209_p0 = scmp.ge.s32.totalorder %s1363_s18, 1  ;;  %s1363_s18 = sphi %s1409_s18, %s15_s18  }
   0x2   : > { %p195_p1 = scmp.lt.s32.totalorder %s1363_s18, 5 }
   0x4   : > { %p196_p2 = pnand %p1209_p0, %p195_p1 }
   0x5   : > { %v239_v0 = vld [vmem:[%s1546_s2] sm:$0xf] (!%p196_p2)  ;;  %vm244_vm0 = vcmask (!%p196_p2), 1043456   ;;  %p225_p3 = scmp.lt.s32.totalorder (!%p196_p2), %s1205_s19, 3  ;;  %v1365_v1 = vmov (!%p196_p2), 0.0   ;;  %vm1366_vm1 = vmmov (!%p196_p2), 0   ;;  %v360_v8 = vlaneseq (!%p196_p2) }
   0x6   : > { %199 = sbr.rel (%p196_p2) target bundleno = 2372 (0x944), region = 40  ;;  %1250 = vmatprep.subr.mxu0 (!%p196_p2), %v1365_v1  ;;  %1252 = vmatprep.mubr.msk.f32.mxu0 (!%p196_p2), %vm1366_vm1, %v1365_v1  ;;  %v1367_v2 = vmov (!%p196_p2), 67   ;;  %vm240_vm2 = vcmask (!%p196_p2), 31744   ;;  %v1368_v4 = vmov (!%p196_p2), 66   ;;  %s1369_s26 = smov (!%p196_p2), 64   ;;  %vm369_vm5 = vcmask (!%p196_p2), 64512  }
   0x7   : > { %1251 = vmatpush3.msk.msra.mxu0 (!%p196_p2), %vm244_vm0, %v239_v0  ;;  %1327 = vset.pattern.permute.xlu1 (!%p196_p2), %v1367_v2  ;;  %v1435_v9 = vshrl.u32 (!%p196_p2), %v360_v8, 7  ;;  %s1370_s30 = smov (!%p196_p2), 96   ;;  %v583_v45 = vld [vmem:[%s1547_s3] sm:$0xff] (!%p196_p2)  ;;  %v584_v46 = vld [vmem:[%s1547_s3 + $0x8] sm:$0xff] (!%p196_p2)  ;;  %v585_v47 = vld [vmem:[%s1547_s3 + $0x10] sm:$0xff] (!%p196_p2)  ;;  %v1371_v51 = vmov (!%p196_p2), 35  }
   0x8   : > { %1255 = vmatprep.subr.mxu1 (!%p196_p2), %v1365_v1  ;;  %1260 = vmatprep.subr.mxu0 (!%p196_p2), %v1365_v1  ;;  %v1296_v48 = vpack.c.bf16 (!%p196_p2), %v584_v46, %v583_v45  ;;  %v586_v49 = vld [vmem:[%s1547_s3 + $0x18] sm:$0xff] (!%p196_p2)  ;;  %v1215_v52 = vld [vmem:[%s1548_s4] ss:$0 sm:$0xff] (!%p196_p2)  ;;  %v1217_v56 = vld [vmem:[%s1548_s4 + $0x2] ss:$0 sm:$0xff] (!%p196_p2)  ;;  %vm470_vm6 = vcmask (!%p196_p2), 261120  }
   0x9   : > { %1257 = vmatprep.mubr.msk.f32.mxu1 (!%p196_p2), %vm1366_vm1, %v1365_v1  ;;  %1326 = vset.pattern.permute.xlu0 (!%p196_p2), %v1368_v4  ;;  %v362_v11 = vsub.s32 (!%p196_p2), 0, %v1435_v9  ;;  %v478_v12 = vsub.s32 (!%p196_p2), 1, %v1435_v9  ;;  %v1300_v50 = vpack.c.bf16 (!%p196_p2), %v586_v49, %v585_v47  ;;  %v1219_v57 = vld [vmem:[%s1548_s4 + $0x1] ss:$0 sm:$0xff] (!%p196_p2)  ;;  %v1218_v59 = vld [vmem:[%s1548_s4 + $0x3] ss:$0 sm:$0xff] (!%p196_p2) }
   0xa   : > { %s1373_s24 = smov (!%p196_p2), 8   ;;  %vm935_vm9 = vcmask (!%p196_p2), 130112   ;;  %vm810_vm12 = vcmask (!%p196_p2), 130048   ;;  %s1376_s7 = smov (!%p196_p2), 16   ;;  %vm920_vm13 = vcmask (!%p196_p2), 261248   ;;  %vm1030_vm14 = vcmask (!%p196_p2), 392448  }
   0xb   : > { %s1377_s8 = smov (!%p196_p2), 32   ;;  %vm1138_vm15 = vcmask (!%p196_p2), 523648  }
   0xd   : > { %s1551_s19 = smov (!%p225_p3, %s1205_s19), 3 }
   0xe   : > { %s1425_s22 = sshll.u32 %s1551_s19, 3 }
   0xf   : > { %s228_s25 = scalar_lea.vmem %s1544_s0, %s1425_s22  ;;  %s232_s29 = scalar_lea.vmem %s1545_s1, %s1425_s22 }
  0x10   : > { %v237_v3 = vld [vmem:[%s228_s25] sm:$0xff]  ;;  %s1374_s25 = smov 120   ;;  %s236_s6 = scalar_lea.vmem %s1549_s5, %s1425_s22 }
  0x11   : > { %1253 = vmatmul.mubr.msk.f32.vlgmr.msra.gmra.mrb[0].mxu0 %vm240_vm2, %v237_v3  ;;  %v1447_v19 = vld [vmem:[%s232_s29] sm:$0xff]  ;;  %s1378_s22 = smov 48  }
  0x12   : > { %1262 = vmatprep.mubr.msk.f32.mxu0 %vm1366_vm1, %v1365_v1 }
  0xe4   : > { %v314_v5 = vpop.f32.mrb[0].mxu0 }
  0xe5   : > { %473 = vperm.xlu1 %1327, %v314_v5   ;;  %319 = vrot.lane.b32.xlu0 %v314_v5, %s1369_s26  ;;  %v1254_v6 = vpop.f32.mrb[1].mxu0  ;;  %s1375_s26 = smov 112  }
  0xe6   : > { %1256 = vmatpush3.msra.mxu1 %v314_v5 }
  0xe7   : > { %1297 = vmatprep.subr.bf16.mxu1 %v1296_v48 }
  0xe9   : > { %357 = vperm.xlu0 %1326, %v314_v5  }
 0x157   : > { %v320_v7 = vpop.permute.xlu0 %319 }
 0x158   : > { %322 = vxpose.xlu1.b32.start.end [1/1] (short) (narrow) %v320_v7, 8  ;;  %v1372_v7 = vmov 34  }
 0x159   : > { %1328 = vset.pattern.permute.xlu0 %v1372_v7 }
 0x164   : > { %v474_v10 = vpop.permute.xlu1 %473 }
 0x168   : > { %v358_v16 = vpop.permute.xlu0 %357 }
 0x176   : > { %1329 = vset.pattern.permute.xlu1 %v1371_v51 }
 0x1d8   : > { %v338_v13 = vpop.trf.xlu1 }
 0x1d9   : > { %v363_v14 = vrot.slane %v338_v13, %v362_v11  ;;  %v479_v15 = vrot.slane %v338_v13, %v478_v12 }
 0x1db   : > { %v364_v17 = vadd.f32 %v363_v14, %v358_v16  ;;  %v480_v18 = vadd.f32 %v479_v15, %v474_v10 }
 0x1dd   : > { %vm365_vm3 = vcmp.gt.f32.partialorder %v364_v17, 0.0  ;;  %v366_v20 = vmul.f32 0.2, %v364_v17  ;;  %vm481_vm4 = vcmp.gt.f32.partialorder %v480_v18, 0.0  ;;  %v482_v21 = vmul.f32 0.2, %v480_v18 }
 0x1df   : > { %v367_v22 = vsel %vm365_vm3, %v364_v17, %v366_v20  ;;  %v483_v23 = vsel %vm481_vm4, %v480_v18, %v482_v21 }
 0x1e0   : > { %v368_v24 = vadd.f32 %v367_v22, %v1447_v19  ;;  %v484_v26 = vadd.f32 %v483_v23, %v1447_v19 }
 0x1e2   : > { %v370_v25 = vsel %vm369_vm5, %v368_v24, -inf  ;;  %v485_v27 = vsel %vm369_vm5, %v484_v26, -inf }
 0x1e3   : > { %371 = vmax.xlane.f32.xlu0 %v370_v25 }
 0x1e7   : > { %486 = vmax.xlane.f32.xlu0 %v485_v27 }
 0x270   : > { %v372_v28 = vpop.xlane.xlu0 %371 }
 0x271   : > { %v373_v29 = vsub.f32 %v368_v24, %v372_v28 }
 0x273   : > { %v374_v30 = vmul.f32 1.442695, %v373_v29 }
 0x274   : > { %v487_v31 = vpop.xlane.xlu0 %486 }
 0x275   : > { %1333 = vpow2.f32 %v374_v30  ;;  %v488_v32 = vsub.f32 %v484_v26, %v487_v31 }
 0x277   : > { %v489_v33 = vmul.f32 1.442695, %v488_v32 }
 0x279   : > { %1335 = vpow2.f32 %v489_v33 }
 0x27f   : > { %v1334_v34 = vpop.eup %1333 }
 0x280   : > { %v376_v35 = vsel %vm369_vm5, %v1334_v34, 0.0 }
 0x281   : > { %377 = vadd.xlane.f32.xlu1 %v376_v35 }
 0x283   : > { %v1336_v36 = vpop.eup %1335 }
 0x284   : > { %v491_v37 = vsel %vm369_vm5, %v1336_v36, 0.0 }
 0x285   : > { %492 = vadd.xlane.f32.xlu0 %v491_v37 }
 0x29b   : > { %501 = vrot.lane.b32.xlu0 %v314_v5, %s1370_s30 }
 0x30e   : > { %v378_v38 = vpop.xlane.xlu1 %377 }
 0x30f   : > { %1337 = vrcp.f32 %v378_v38 }
 0x312   : > { %v493_v39 = vpop.xlane.xlu0 %492 }
 0x313   : > { %1339 = vrcp.f32 %v493_v39 }
 0x316   : > { %v502_v40 = vpop.permute.xlu0 %501 }
 0x317   : > { %1261 = vmatpush3.msra.mxu0 %v502_v40 }
 0x318   : > { %1276 = vmatprep.subr.mxu0 %v1365_v1 }
 0x319   : > { %v1338_v41 = vpop.eup %1337 }
 0x31a   : > { %v380_v42 = vmul.f32 %v1338_v41, %v1334_v34 }
 0x31c   : > { %1258 = vmatmul.mubr.msk.f32.vlgmr.msra.gmra.mrb[0].mxu1 %vm369_vm5, %v380_v42 }
 0x31d   : > { %v1340_v43 = vpop.eup %1339  ;;  %1299 = vmatpush3.bf16.msra.mxu1 %v1296_v48 }
 0x31e   : > { %v495_v44 = vmul.f32 %v1340_v43, %v1336_v36  ;;  %1301 = vmatprep.subr.bf16.mxu1 %v1300_v50 }
 0x320   : > { %1263 = vmatmul.mubr.msk.f32.vlgmr.msra.gmra.mrb[2].mxu0 %vm369_vm5, %v495_v44 }
 0x321   : > { %1278 = vmatprep.mubr.msk.f32.mxu0 %vm1366_vm1, %v1365_v1  ;;  %1303 = vmatpush3.bf16.msra.mxu1 %v1300_v50 }
 0x322   : > { %1286 = vmatprep.subr.mxu1 %v1365_v1 }
 0x3ef   : > { %v455_v53 = vpop.f32.mrb[0].mxu1 }
 0x3f0   : > { %v456_v54 = vadd.f32 %v1215_v52, %v455_v53  ;;  %v1259_v55 = vpop.f32.mrb[1].mxu1 }
 0x3f2   : > { %v459_v58 = vmax.f32 %v456_v54, 0.0 }
 0x3f3   : > { %v573_v60 = vpop.f32.mrb[2].mxu0 }
 0x3f4   : > { %v464_v61 = vmul.f32 %v1217_v56, %v459_v58  ;;  %v574_v62 = vadd.f32 %v1219_v57, %v573_v60  ;;  %v1264_v63 = vpop.f32.mrb[3].mxu0 }
 0x3f6   : > { %v469_v0 = vadd.f32 %v1218_v59, %v464_v61  ;;  %v577_v2 = vmax.f32 %v574_v62, 0.0 }
 0x3f8   : > { %v578_v3 = vmul.f32 %v1217_v56, %v577_v2  ;;  %471 = vst.msk [vmem:[#allocation2] sm:$0xff] %vm470_vm6, %v469_v0 }
 0x3fa   : > { %v579_v4 = vadd.f32 %v1218_v59, %v578_v3 }
 0x3fc   : > { %580 = vst.msk [vmem:[#allocation2 + $0x8] sm:$0xff] %vm470_vm6, %v579_v4  ;;  %v1223_v4 = vld [vmem:[%s1548_s4 + $0x4] ss:$0 sm:$0xff] }
 0x3ff   : > { %v581_v5 = vld [vmem:[#allocation2] sm:$0xff] }
 0x400   : > { %1273 = vmatprep.mubr.msk.f32.mxu1 %vm470_vm6, %v581_v5 }
 0x403   : > { %v582_v6 = vld [vmem:[#allocation2 + $0x8] sm:$0xff] }
 0x404   : > { %1274 = vmatmul.mubr.msk.f32.vlgmr.msra.gmra.mrb[2].mxu1 %vm470_vm6, %v582_v6 }
 0x405   : > { %1288 = vmatprep.mubr.msk.f32.mxu1 %vm1366_vm1, %v1365_v1 }
 0x4d7   : > { %v1489_v8 = vpop.f32.mrb[2].mxu1 }
 0x4d8   : > { %1033 = vperm.xlu1 %1329, %v1489_v8   ;;  %v1492_v10 = vpop.f32.mrb[3].mxu1  ;;  %1287 = vmatpush3.msra.mxu1 %v1489_v8 }
 0x4d9   : > { %670 = vrot.lane.b32.xlu0 %v1492_v10, %s1370_s30  ;;  %1277 = vmatpush3.msra.mxu0 %v1492_v10 }
 0x4da   : > { %1281 = vmatprep.subr.mxu0 %v1365_v1 }
 0x4dc   : > { %1330 = vset.pattern.permute.xlu1 %v1372_v7 }
 0x4dd   : > { %672 = vrot.lane.b32.xlu0 %v1489_v8, %s1370_s30 }
 0x4e1   : > { %923 = vperm.xlu0 %1328, %v1489_v8  }
 0x4e5   : > { %931 = vrot.lane.b32.xlu0 %v1447_v19, %s1373_s24 }
 0x54b   : > { %v671_v13 = vpop.permute.xlu0 %670 }
 0x54c   : > { %676 = vxpose.xlu0.b32.start [1/2] (short) (narrow) %v671_v13, 8 }
 0x54f   : > { %v673_v14 = vpop.permute.xlu0 %672 }
 0x550   : > { %677 = vxpose.xlu0.b32.end [2/2] (short) (narrow) %v673_v14, 8 }
 0x557   : > { %v1034_v21 = vpop.permute.xlu1 %1033 }
 0x560   : > { %v924_v15 = vpop.permute.xlu0 %923 }
 0x564   : > { %v932_v16 = vpop.permute.xlu0 %931 }
 0x579   : > { %1332 = vset.pattern.permute.xlu0 %v1371_v51 }
 0x5cc   : > { %v692_v17 = vpop.trf.xlu0 }
 0x5cd   : > { %v716_v18 = vrot.slane %v692_v17, %v362_v11  ;;  %v819_v20 = vrot.slane %v692_v17, %v478_v12 }
 0x5cf   : > { %v926_v22 = vadd.f32 %v924_v15, %v716_v18  ;;  %v1036_v23 = vadd.f32 %v1034_v21, %v819_v20 }
 0x5d1   : > { %vm1037_vm7 = vcmp.gt.f32.partialorder %v1036_v23, 0.0  ;;  %v1038_v24 = vmul.f32 0.2, %v1036_v23  ;;  %vm927_vm8 = vcmp.gt.f32.partialorder %v926_v22, 0.0  ;;  %v928_v25 = vmul.f32 0.2, %v926_v22 }
 0x5d3   : > { %v1039_v26 = vsel %vm1037_vm7, %v1036_v23, %v1038_v24  ;;  %v929_v27 = vsel %vm927_vm8, %v926_v22, %v928_v25 }
 0x5d4   : > { %v1040_v28 = vadd.f32 %v1039_v26, %v932_v16  ;;  %v934_v29 = vadd.f32 %v932_v16, %v929_v27 }
 0x5d6   : > { %v1041_v30 = vsel %vm935_vm9, %v1040_v28, -inf  ;;  %v936_v31 = vsel %vm935_vm9, %v934_v29, -inf }
 0x5d7   : > { %1042 = vmax.xlane.f32.xlu0 %v1041_v30  ;;  %937 = vmax.xlane.f32.xlu1 %v936_v31 }
 0x5e8   : > { %710 = vperm.xlu1 %1330, %v1492_v10  }
 0x5ec   : > { %1331 = vset.pattern.permute.xlu1 %v1371_v51 }
 0x5ed   : > { %813 = vperm.xlu1 %1331, %v1492_v10  }
 0x664   : > { %v1043_v9 = vpop.xlane.xlu0 %1042  ;;  %v938_v11 = vpop.xlane.xlu1 %937 }
 0x665   : > { %v939_v12 = vsub.f32 %v934_v29, %v938_v11  ;;  %v1044_v32 = vsub.f32 %v1040_v28, %v1043_v9 }
 0x667   : > { %v940_v33 = vmul.f32 1.442695, %v939_v12  ;;  %v1045_v35 = vmul.f32 1.442695, %v1044_v32 }
 0x668   : > { %v711_v34 = vpop.permute.xlu1 %710 }
 0x669   : > { %1341 = vpow2.f32 %v940_v33  ;;  %v717_v44 = vadd.f32 %v716_v18, %v711_v34 }
 0x66a   : > { %1343 = vpow2.f32 %v1045_v35 }
 0x66b   : > { %v719_v45 = vmul.f32 0.2, %v717_v44  ;;  %vm718_vm11 = vcmp.gt.f32.partialorder %v717_v44, 0.0 }
 0x66c   : > { %v814_v36 = vpop.permute.xlu1 %813 }
 0x66d   : > { %v820_v37 = vadd.f32 %v819_v20, %v814_v36  ;;  %v720_v46 = vsel %vm718_vm11, %v717_v44, %v719_v45 }
 0x66e   : > { %v721_v47 = vadd.f32 %v720_v46, %v1447_v19 }
 0x66f   : > { %vm821_vm10 = vcmp.gt.f32.partialorder %v820_v37, 0.0  ;;  %v822_v38 = vmul.f32 0.2, %v820_v37 }
 0x670   : > { %v722_v48 = vsel %vm369_vm5, %v721_v47, -inf }
 0x671   : > { %v823_v39 = vsel %vm821_vm10, %v820_v37, %v822_v38 }
 0x672   : > { %v824_v40 = vadd.f32 %v823_v39, %v1447_v19 }
 0x673   : > { %v1342_v41 = vpop.eup %1341 }
 0x674   : > { %v825_v42 = vsel %vm369_vm5, %v824_v40, -inf  ;;  %943 = vrot.lane.b32.xlu1 %v1342_v41, %s1374_s25  ;;  %v1344_v43 = vpop.eup %1343 }
 0x675   : > { %826 = vmax.xlane.f32.xlu0 %v825_v42 }
 0x678   : > { %1048 = vrot.lane.b32.xlu1 %v1344_v43, %s1374_s25 }
 0x69c   : > { %723 = vmax.xlane.f32.xlu1 %v722_v48 }
 0x6e6   : > { %v944_v49 = vpop.permute.xlu1 %943 }
 0x6e7   : > { %v946_v50 = vsel %vm369_vm5, %v944_v49, 0.0 }
 0x6e8   : > { %947 = vadd.xlane.f32.xlu0 %v946_v50 }
 0x6ea   : > { %v1049_v51 = vpop.permute.xlu1 %1048 }
 0x6eb   : > { %v1051_v52 = vsel %vm369_vm5, %v1049_v51, 0.0 }
 0x6ec   : > { %1052 = vadd.xlane.f32.xlu0 %v1051_v52 }
 0x702   : > { %v827_v53 = vpop.xlane.xlu0 %826 }
 0x703   : > { %v828_v54 = vsub.f32 %v824_v40, %v827_v53 }
 0x705   : > { %v829_v57 = vmul.f32 1.442695, %v828_v54 }
 0x729   : > { %v724_v55 = vpop.xlane.xlu1 %723 }
 0x72a   : > { %v725_v56 = vsub.f32 %v721_v47, %v724_v55 }
 0x72c   : > { %v726_v58 = vmul.f32 1.442695, %v725_v56 }
 0x72e   : > { %1345 = vpow2.f32 %v726_v58 }
 0x72f   : > { %1347 = vpow2.f32 %v829_v57 }
 0x738   : > { %v1346_v19 = vpop.eup %1345 }
 0x739   : > { %v728_v59 = vsel %vm369_vm5, %v1346_v19, 0.0  ;;  %v1348_v60 = vpop.eup %1347 }
 0x73a   : > { %729 = vadd.xlane.f32.xlu0 %v728_v59  ;;  %v831_v61 = vsel %vm369_vm5, %v1348_v60, 0.0 }
 0x73e   : > { %832 = vadd.xlane.f32.xlu0 %v831_v61 }
 0x754   : > { %836 = vrot.lane.b32.xlu0 %v1492_v10, %s1375_s26 }
 0x758   : > { %1059 = vrot.lane.b32.xlu0 %v1489_v8, %s1375_s26 }
 0x775   : > { %v948_v62 = vpop.xlane.xlu0 %947 }
 0x776   : > { %1349 = vrcp.f32 %v948_v62 }
 0x779   : > { %v1053_v63 = vpop.xlane.xlu0 %1052 }
 0x77a   : > { %1351 = vrcp.f32 %v1053_v63 }
 0x780   : > { %v1350_v0 = vpop.eup %1349 }
 0x781   : > { %v950_v2 = vmul.f32 %v1350_v0, %v1342_v41 }
 0x783   : > { %952 = vrot.lane.b32.xlu1 %v950_v2, %s1374_s25 }
 0x784   : > { %v1352_v3 = vpop.eup %1351 }
 0x785   : > { %v1055_v5 = vmul.f32 %v1352_v3, %v1344_v43 }
 0x787   : > { %1057 = vrot.lane.b32.xlu0 %v1055_v5, %s1374_s25  ;;  %840 = vrot.lane.b32.xlu1 %v1223_v4, %s1375_s26 }
 0x7c7   : > { %v730_v6 = vpop.xlane.xlu0 %729 }
 0x7c8   : > { %1353 = vrcp.f32 %v730_v6 }
 0x7cb   : > { %v833_v7 = vpop.xlane.xlu0 %832 }
 0x7cc   : > { %1355 = vrcp.f32 %v833_v7 }
 0x7cf   : > { %v837_v13 = vpop.permute.xlu0 %836 }
 0x7d2   : > { %v1354_v8 = vpop.eup %1353 }
 0x7d3   : > { %v732_v10 = vmul.f32 %v1354_v8, %v1346_v19  ;;  %v1060_v16 = vpop.permute.xlu0 %1059 }
 0x7d5   : > { %1279 = vmatmul.mubr.msk.f32.vlgmr.msra.gmra.mrb[4].mxu0 %vm369_vm5, %v732_v10 }
 0x7d6   : > { %v1356_v14 = vpop.eup %1355  ;;  %1282 = vmatpush3.msra.mxu0 %v837_v13  ;;  %1283 = vmatprep.mubr.msk.f32.mxu0 %vm1366_vm1, %v1365_v1 }
 0x7d7   : > { %v835_v15 = vmul.f32 %v1356_v14, %v1348_v60  ;;  %1291 = vmatprep.subr.mxu0 %v1365_v1 }
 0x7d9   : > { %1284 = vmatmul.mubr.msk.f32.vlgmr.msra.gmra.mrb[6].mxu0 %vm369_vm5, %v835_v15 }
 0x7da   : > { %1292 = vmatpush3.msra.mxu0 %v1060_v16  ;;  %1293 = vmatprep.mubr.msk.f32.mxu0 %vm1366_vm1, %v1365_v1 }
 0x7f5   : > { %v953_v17 = vpop.permute.xlu1 %952 }
 0x7f6   : > { %1289 = vmatmul.mubr.msk.f32.vlgmr.msra.gmra.mrb[4].mxu1 %vm369_vm5, %v953_v17 }
 0x7f9   : > { %v1058_v18 = vpop.permute.xlu0 %1057  ;;  %v841_v23 = vpop.permute.xlu1 %840 }
 0x7fa   : > { %1294 = vmatmul.mubr.msk.f32.vlgmr.msra.gmra.mrb[8].mxu0 %vm369_vm5, %v1058_v18 }
 0x8a8   : > { %v806_v20 = vpop.f32.mrb[4].mxu0 }
 0x8a9   : > { %v807_v21 = vadd.f32 %v1223_v4, %v806_v20  ;;  %v1280_v22 = vpop.f32.mrb[5].mxu0 }
 0x8ab   : > { %811 = vst.msk [vmem:[%s236_s6] sm:$0xff] %vm810_vm12, %v807_v21 }
 0x8ac   : > { %v912_v24 = vpop.f32.mrb[6].mxu0 }
 0x8ad   : > { %v913_v25 = vadd.f32 %v912_v24, %v841_v23  ;;  %v1285_v26 = vpop.f32.mrb[7].mxu0 }
 0x8af   : > { %917 = vrot.lane.b32.xlu0 %v913_v25, %s1376_s7 }
 0x8c9   : > { %v1022_v1 = vpop.f32.mrb[4].mxu1 }
 0x8ca   : > { %v1023_v27 = vadd.f32 %v1223_v4, %v1022_v1  ;;  %v1290_v28 = vpop.f32.mrb[5].mxu1 }
 0x8cc   : > { %1027 = vrot.lane.b32.xlu1 %v1023_v27, %s1377_s8 }
 0x8cd   : > { %v1130_v29 = vpop.f32.mrb[8].mxu0 }
 0x8ce   : > { %v1131_v30 = vadd.f32 %v1130_v29, %v841_v23  ;;  %v1295_v31 = vpop.f32.mrb[9].mxu0 }
 0x8d0   : > { %1135 = vrot.lane.b32.xlu0 %v1131_v30, %s1378_s22 }
 0x921   : > { %v918_v9 = vpop.permute.xlu0 %917 }
 0x922   : > { %921 = vst.msk [vmem:[%s236_s6] sm:$0xff] %vm920_vm13, %v918_v9 }
 0x93e   : > { %v1028_v11 = vpop.permute.xlu1 %1027 }
 0x93f   : > { %1031 = vst.msk [vmem:[%s236_s6] sm:$0xff] %vm1030_vm14, %v1028_v11 }
 0x942   : > { %v1136_v12 = vpop.permute.xlu0 %1135 }
 0x943   : > { %1139 = vst.msk [vmem:[%s236_s6] sm:$0xff] %vm1138_vm15, %v1136_v12 }
 0x944 PF: > { %s15_s18 = sadd.s32 1, %s1363_s18  }
 0x945   : > { %p12_p4 = scmp.ge.s32.totalorder %s15_s18, 6  }
 0x947   :  { %14 = sbr.rel (!%p12_p4) target bundleno = 1 (0x1), region = 73 }

</bundles_post_ra>
